<compile_context>
chip_gen: v5e
topology: v5e:2x2
jax: 0.10.0
libtpu: 0.0.40
codegen_flags: <defaults>
</compile_context>

<pallas_src>
import jax
import jax.numpy as jnp
from jax.experimental import pallas as pl
from jax.experimental.pallas import tpu as pltpu

EPS = 1e-5                 # PyTorch LayerNorm default eps
NEG_INF = -1e30            # finite "-inf" so online softmax never NaNs on masked blocks
MATMUL_DTYPE = jnp.bfloat16


def _layernorm(x, g, b):
    mean = jnp.mean(x, axis=-1, keepdims=True)
    var = jnp.mean((x - mean) ** 2, axis=-1, keepdims=True)
    return (x - mean) * jax.lax.rsqrt(var + EPS) * g + b


# ----------------------------------------------------------------------------
# Kernels
# ----------------------------------------------------------------------------
def _make_kv_proj_kernel(num_heads, head_dim, emb):
    def kernel(x_ref, wkv_ref, bkv_ref, kv_ref):
        x = x_ref[0].astype(MATMUL_DTYPE)                        # (TS, E)
        # One wide matmul: K|V concatenated head-major -> (TS, 2E), f32 accumulation.
        kv = jnp.dot(x, wkv_ref[...], preferred_element_type=jnp.float32) + bkv_ref[...]
        for h in range(num_heads):                               # lane slices hide under MXU
            kv_ref[0, 0, h] = kv[:, h * head_dim:(h + 1) * head_dim].astype(kv_ref.dtype)
            kv_ref[0, 1, h] = kv[:, emb + h * head_dim:emb + (h + 1) * head_dim].astype(kv_ref.dtype)
    return kernel


def _make_layer_kernel(num_heads, head_dim, tq, tkv, n_ff_chunks, use_mask,
                       apply_final_norm, is_causal, exp_dtype):
    emb = num_heads * head_dim
    scale = 1.0 / (head_dim ** 0.5)

    def kernel(*refs):
        it = iter(refs)
        x_ref, kv_ref = next(it), next(it)
        mask_ref = next(it) if use_mask else None
        wq_ref, bq_ref = next(it), next(it)
        wo_ref, bo_ref = next(it), next(it)
        g1_ref, be1_ref = next(it), next(it)
        w1_ref, b1_ref = next(it), next(it)
        w2_ref, b2_ref = next(it), next(it)
        g2_ref, be2_ref = next(it), next(it)
        gf_ref = bf_ref = None
        if apply_final_norm:
            gf_ref, bf_ref = next(it), next(it)
        o_ref = next(it)
        q_scr, m_scr, l_scr, acc_scr = next(it), next(it), next(it), next(it)

        qi = pl.program_id(1)
        ki = pl.program_id(2)
        nk = pl.num_programs(2)

        @pl.when(ki == 0)
        def _init():
            # Q projection once per query tile as ONE (TQ,E)@(E,E) matmul (full MXU
            # output width); head-major output columns, 1/sqrt(dh) folded in.
            xq = x_ref[0].astype(MATMUL_DTYPE)                   # (TQ, E)
            qf = (jnp.dot(xq, wq_ref[...], preferred_element_type=jnp.float32)
                  + bq_ref[...]) * scale
            for h in range(num_heads):                           # lane slices hide under MXU
                q_scr[h] = qf[:, h * head_dim:(h + 1) * head_dim].astype(MATMUL_DTYPE)
            m_scr[...] = jnp.full(m_scr.shape, NEG_INF, m_scr.dtype)
            l_scr[...] = jnp.zeros(l_scr.shape, l_scr.dtype)
            acc_scr[...] = jnp.zeros(acc_scr.shape, acc_scr.dtype)

        def _attend():
            k = kv_ref[0, 0]                                     # (H, TKV, dh) bf16
            v = kv_ref[0, 1]
            # Scores for this KV block, all heads batched on the MXU, f32 acc.
            s = jnp.einsum("hqd,hkd->hqk", q_scr[...], k,
                           preferred_element_type=jnp.float32)
            if use_mask:
                s = s + mask_ref[...]                            # additive float mask

            # Online-softmax (flash) update; statistics stay f32.
            m_prev = m_scr[...]
            m_new = jnp.maximum(m_prev, jnp.max(s, axis=-1, keepdims=True))
            alpha = jnp.exp(m_prev - m_new)
            # exp in bf16 on v6e/v7x (EUP ~2x throughput); f32 on v5e (no bf16 EUP).
            p = jnp.exp((s - m_new).astype(exp_dtype))
            l_scr[...] = alpha * l_scr[...] + jnp.sum(p.astype(jnp.float32),
                                                      axis=-1, keepdims=True)
            acc_scr[...] = alpha * acc_scr[...] + jnp.einsum(
                "hqk,hkd->hqd", p.astype(MATMUL_DTYPE), v,
                preferred_element_type=jnp.float32)
            m_scr[...] = m_new

        if is_causal:
            # Skip KV blocks entirely above the diagonal (fully masked): ~2x on the
            # attention portion for causal masks.
            # TODO(synk): also skip the K/V DMA for dead blocks via a data-dependent
            # index_map with PrefetchScalarGridSpec.
            pl.when(ki * tkv <= (qi + 1) * tq - 1)(_attend)
        else:
            _attend()

        @pl.when(ki == nk - 1)
        def _epilogue():
            # Guard l==0 (fully-masked rows, e.g. padding masks) before reciprocal.
            inv_l = pl.reciprocal(jnp.maximum(l_scr[...], 1e-30), approx=True)
            ctx = acc_scr[...] * inv_l                           # (H, TQ, dh) f32

            # Merge heads (lane concat) so the output projection is ONE (TQ,E)@(E,E)
            # matmul with full contraction depth (no per-head K=dh matmuls).
            ctx2 = jnp.concatenate([ctx[h] for h in range(num_heads)],
                                   axis=-1).astype(MATMUL_DTYPE)  # (TQ, E)
            sa = jnp.dot(ctx2, wo_ref[...],
                         preferred_element_type=jnp.float32) + bo_ref[...]

            x = x_ref[0].astype(jnp.float32)
            h1 = _layernorm(x + sa, g1_ref[...], be1_ref[...])   # post-norm

            # FFN chunked over F to bound the live (TQ, tf) intermediate.
            h1c = h1.astype(MATMUL_DTYPE)
            ff = jnp.zeros((tq, emb), jnp.float32)
            for c in range(n_ff_chunks):
                t = jnp.dot(h1c, w1_ref[c], preferred_element_type=jnp.float32) + b1_ref[c]
                t = jnp.maximum(t, 0.0)                          # ReLU (PyTorch default)
                ff = ff + jnp.dot(t.astype(MATMUL_DTYPE), w2_ref[c],
                                  preferred_element_type=jnp.float32)
            ff = ff + b2_ref[...]

            y = _layernorm(h1 + ff, g2_ref[...], be2_ref[...])
            if apply_final_norm:                                 # fused final encoder norm
                y = _layernorm(y, gf_ref[...], bf_ref[...])
            o_ref[0] = y.astype(o_ref.dtype)

    return kernel


# ----------------------------------------------------------------------------
# Tiling / VMEM helpers
# ----------------------------------------------------------------------------
def _vmem_capacity():
    try:
        return int(pltpu.get_tpu_info().vmem_capacity_bytes)     # per-core budget
    except Exception:
        return 64 << 20                                          # assume smallest (v7x)


def _vmem_need_bytes(E, F, H, dh, tq, tkv, tf, single_buf_weights):
    """Rough per-core VMEM footprint of the fused layer kernel."""
    wmul = 1 if single_buf_weights else 2
    weights = wmul * 2 * (2 * E * E + 2 * E * F)                 # bf16 wq, wo, w1, w2
    io = 2 * (4 * tq * E                                         # x tile (f32 worst case)
              + 2 * 2 * H * tkv * dh                             # merged K/V block (bf16)
              + 4 * tq * tkv                                     # additive mask
              + 4 * tq * E)                                      # output tile
    scratch = 2 * H * tq * dh + 4 * H * tq * dh + 8 * H * tq     # q(bf16), acc(f32), m/l
    temps = 4 * (3 * H * tq * tkv + 3 * tq * tf + 4 * tq * E)    # scores/p, FFN chunk, LN
    return weights + io + scratch + temps


def _vmem_limit_bytes(need_bytes):
    cap = _vmem_capacity()
    return int(min(max(need_bytes + (8 << 20), 32 << 20), int(cap * 0.9)))


def _pick_q_tile(S, fits):
    cand = [t for t in (256, 128, 64, 32, 16, 8) if S % t == 0]
    if not cand:
        return S
    for t in cand:                      # prefer the largest tile that fits VMEM
        if fits(t):
            return t
    return cand[-1]


def _pick_kv_tile(S):
    for t in (512, 256, 128):           # mask minor dim must be lane-dense (x128) or full
        if S % t == 0:
            return t
    return S


def _pick_kv_rows_tile(S):
    for t in (512, 256, 128, 64, 32, 16, 8):
        if S % t == 0:
            return t
    return S


def _pick_ffn_chunk(F):
    # tf=256 keeps the live (TQ, tf) f32 intermediate at half the vreg file while
    # retaining lane-dense, K=E MXU shapes.
    for t in (256, 512, 384, 128):
        if F % t == 0:
            return t
    return F


def _softmax_exp_dtype():
    # bf16 exp doubles EUP throughput on v6e/v7x; v5e/v4 have no bf16 EUP/VPU path.
    try:
        kind = jax.devices()[0].device_kind.lower()
    except Exception:
        return jnp.float32
    if "v6" in kind or "v7" in kind or "7x" in kind:
        return jnp.bfloat16
    return jnp.float32


def _wspec(shape, index_map, single_buffer):
    # Constant-index-map weight slabs never advance, so double-buffering them is pure
    # VMEM waste; single-buffering is what keeps big configs inside v7x's 64 MiB.
    if single_buffer:
        return pl.BlockSpec(shape, index_map, pipeline_mode=pl.Buffered(1))
    return pl.BlockSpec(shape, index_map)


# ----------------------------------------------------------------------------
# Wrappers
# ----------------------------------------------------------------------------
def _run_kv_proj(x, pp, num_heads, head_dim, ts, vmem_limit, single_buf):
    B, S, E = x.shape
    kv_shape = jax.ShapeDtypeStruct((B, 2, num_heads, S, head_dim), MATMUL_DTYPE)
    return pl.pallas_call(
        _make_kv_proj_kernel(num_heads, head_dim, E),
        out_shape=kv_shape,
        grid=(B, S // ts),
        in_specs=[
            pl.BlockSpec((1, ts, E), lambda b, s: (b, s, 0)),
            _wspec((E, 2 * E), lambda b, s: (0, 0), single_buf),
            _wspec((1, 2 * E), lambda b, s: (0, 0), single_buf),
        ],
        out_specs=pl.BlockSpec((1, 2, num_heads, ts, head_dim),
                               lambda b, s: (b, 0, 0, s, 0)),
        compiler_params=pltpu.CompilerParams(
            dimension_semantics=("parallel", "parallel"),
            vmem_limit_bytes=vmem_limit),
    )(x, pp["wkv"], pp["bkv"])


def _run_attn_ffn(x, kv_hm, mask, pp, num_heads, head_dim, tq, tkv, tf,
                  final_norm, is_causal, exp_dtype, out_dtype, vmem_limit, single_buf):
    B, S, E = x.shape
    use_mask = mask is not None
    apply_final_norm = final_norm is not None
    nf = pp["w1c"].shape[0]

    c2 = lambda b, q, k: (0, 0)
    c3 = lambda b, q, k: (0, 0, 0)

    in_specs = [
        pl.BlockSpec((1, tq, E), lambda b, q, k: (b, q, 0)),                        # x
        pl.BlockSpec((1, 2, num_heads, tkv, head_dim),
                     lambda b, q, k: (b, 0, 0, k, 0)),                              # merged K/V
    ]
    args = [x, kv_hm]
    if use_mask:
        in_specs.append(pl.BlockSpec((tq, tkv), lambda b, q, k: (q, k)))
        args.append(mask)
    in_specs += [
        _wspec((E, E), c2, single_buf),        # wq
        _wspec((1, E), c2, single_buf),        # bq
        _wspec((E, E), c2, single_buf),        # wo
        _wspec((1, E), c2, single_buf),        # bo
        _wspec((1, E), c2, single_buf),        # g1
        _wspec((1, E), c2, single_buf),        # be1
        _wspec((nf, E, tf), c3, single_buf),   # w1 chunks
        _wspec((nf, 1, tf), c3, single_buf),   # b1 chunks
        _wspec((nf, tf, E), c3, single_buf),   # w2 chunks
        _wspec((1, E), c2, single_buf),        # b2
        _wspec((1, E), c2, single_buf),        # g2
        _wspec((1, E), c2, single_buf),        # be2
    ]
    args += [pp["wq"], pp["bq"], pp["wo"], pp["bo"], pp["g1"], pp["be1"],
             pp["w1c"], pp["b1c"], pp["w2c"], pp["b2"], pp["g2"], pp["be2"]]
    if apply_final_norm:
        in_specs += [_wspec((1, E), c2, single_buf), _wspec((1, E), c2, single_buf)]
        args += [final_norm["g"], final_norm["b"]]

    kernel = _make_layer_kernel(num_heads, head_dim, tq, tkv, nf, use_mask,
                                apply_final_norm, is_causal, exp_dtype)

    return pl.pallas_call(
        kernel,
        out_shape=jax.ShapeDtypeStruct((B, S, E), out_dtype),
        grid=(B, S // tq, S // tkv),
        in_specs=in_specs,
        out_specs=pl.BlockSpec((1, tq, E), lambda b, q, k: (b, q, 0)),
        scratch_shapes=[
            pltpu.VMEM((num_heads, tq, head_dim), MATMUL_DTYPE),   # scaled Q
            pltpu.VMEM((num_heads, tq, 1), jnp.float32),           # running max
            pltpu.VMEM((num_heads, tq, 1), jnp.float32),           # running sum
            pltpu.VMEM((num_heads, tq, head_dim), jnp.float32),    # context accumulator
        ],
        compiler_params=pltpu.CompilerParams(
            # B * (S // tq) >= 2 keeps both v7x TensorCores busy.
            dimension_semantics=("parallel", "parallel", "arbitrary"),
            vmem_limit_bytes=vmem_limit),
    )(*args)


def _prep_layer_params(p, tf):
    E = p["wq"].shape[0]
    F = p["w1"].shape[1]
    nf = F // tf
    cd = MATMUL_DTYPE
    return {
        "wq": p["wq"].astype(cd), "bq": p["bq"],
        "wkv": jnp.concatenate([p["wk"], p["wv"]], axis=1).astype(cd),  # (E, 2E)
        "bkv": jnp.concatenate([p["bk"], p["bv"]], axis=1),             # (1, 2E)
        "wo": p["wo"].astype(cd), "bo": p["bo"],
        "g1": p["g1"], "be1": p["be1"],
        "w1c": p["w1"].reshape(E, nf, tf).transpose(1, 0, 2).astype(cd),
        "b1c": p["b1"].reshape(nf, 1, tf),
        "w2c": p["w2"].reshape(nf, tf, E).astype(cd),
        "b2": p["b2"], "g2": p["g2"], "be2": p["be2"],
    }


def transformer_encoder(src, mask, layer_params, final_norm_params, num_heads,
                        is_causal=False):
    """Pallas implementation of TransformerEncoder.forward (eval mode, batch-first)."""
    B, S, E = src.shape
    assert E % num_heads == 0
    dh = E // num_heads
    F = layer_params[0]["w1"].shape[1]

    if is_causal and mask is None:        # best-effort parity with PyTorch's is_causal hint
        mask = jnp.where(jnp.arange(S)[None, :] <= jnp.arange(S)[:, None],
                         0.0, -jnp.inf).astype(jnp.float32)

    tf = _pick_ffn_chunk(F)
    tkv = _pick_kv_tile(S)
    ts = _pick_kv_rows_tile(S)            # KV-proj row tile, decoupled from tq

    # Single-buffer the resident weight slabs once they are big enough to matter
    # (keeps the fused-layer design inside v7x's 64 MiB per-core VMEM).
    single_buf_weights = 2 * (2 * E * E + 2 * E * F) > (4 << 20)

    cap = _vmem_capacity()
    fits = lambda t: _vmem_need_bytes(E, F, num_heads, dh, t, tkv, tf,
                                      single_buf_weights) <= int(cap * 0.85)
    tq = _pick_q_tile(S, fits)
    vmem_limit = _vmem_limit_bytes(
        _vmem_need_bytes(E, F, num_heads, dh, tq, tkv, tf, single_buf_weights))
    exp_dtype = _softmax_exp_dtype()

    x = src
    n = len(layer_params)
    for i, p in enumerate(layer_params):
        pp = _prep_layer_params(p, tf)
        kv = _run_kv_proj(x, pp, num_heads, dh, ts, vmem_limit, single_buf_weights)
        fuse_norm = final_norm_params if (i == n - 1 and final_norm_params is not None) else None
        # Carry inter-layer activations in bf16 (halves x HBM traffic, biggest win on
        # v5e); the final layer returns the caller's dtype.
        out_dtype = src.dtype if i == n - 1 else MATMUL_DTYPE
        x = _run_attn_ffn(x, kv, mask, pp, num_heads, dh, tq, tkv, tf, fuse_norm,
                          is_causal, exp_dtype, out_dtype, vmem_limit, single_buf_weights)
    return x


# ----------------------------------------------------------------------------
# Deterministic init + pure-JAX reference for verification
# ----------------------------------------------------------------------------
def init_layer_params(key, E, F):
    ks = jax.random.split(key, 16)
    s = 0.1
    n = lambda i, shape: s * jax.random.normal(ks[i], shape, jnp.float32)
    return {
        # weights stored (in, out)  (== PyTorch weight.T)
        "wq": n(0, (E, E)), "bq": n(1, (1, E)),
        "wk": n(2, (E, E)), "bk": n(3, (1, E)),
        "wv": n(4, (E, E)), "bv": n(5, (1, E)),
        "wo": n(6, (E, E)), "bo": n(7, (1, E)),
        "g1": 1.0 + n(8, (1, E)), "be1": n(9, (1, E)),
        "w1": n(10, (E, F)), "b1": n(11, (1, F)),
        "w2": n(12, (F, E)), "b2": n(13, (1, E)),
        "g2": 1.0 + n(14, (1, E)), "be2": n(15, (1, E)),
    }


def ref_encoder(src, mask, layer_params, final_norm_params, num_heads):
    B, S, E = src.shape
    dh = E // num_heads
    x = src
    for p in layer_params:
        q = x @ p["wq"] + p["bq"]
        k = x @ p["wk"] + p["bk"]
        v = x @ p["wv"] + p["bv"]
        q = q.reshape(B, S, num_heads, dh).transpose(0, 2, 1, 3)
        k = k.reshape(B, S, num_heads, dh).transpose(0, 2, 1, 3)
        v = v.reshape(B, S, num_heads, dh).transpose(0, 2, 1, 3)
        s = jnp.einsum("bhqd,bhkd->bhqk", q, k) / (dh ** 0.5)
        if mask is not None:
            s = s + mask
        pw = jax.nn.softmax(s, axis=-1)
        a = jnp.einsum("bhqk,bhkd->bhqd", pw, v).transpose(0, 2, 1, 3).reshape(B, S, E)
        sa = a @ p["wo"] + p["bo"]
        h1 = _layernorm(x + sa, p["g1"], p["be1"])
        ff = jnp.maximum(h1 @ p["w1"] + p["b1"], 0.0) @ p["w2"] + p["b2"]
        x = _layernorm(h1 + ff, p["g2"], p["be2"])
    if final_norm_params is not None:
        x = _layernorm(x, final_norm_params["g"], final_norm_params["b"])
    return x


if __name__ == "__main__":
    B, S, E, H, F, L = 2, 8, 32, 4, 64, 2
    key = jax.random.PRNGKey(0)
    k_src, k_norm, *k_layers = jax.random.split(key, L + 2)

    src = jax.random.normal(k_src, (B, S, E), jnp.float32)
    layer_params = [init_layer_params(k, E, F) for k in k_layers]
    kg, kb = jax.random.split(k_norm)
    final_norm_params = {"g": 1.0 + 0.1 * jax.random.normal(kg, (1, E), jnp.float32),
                         "b": 0.1 * jax.random.normal(kb, (1, E), jnp.float32)}

    # Additive float causal mask (like nn.Transformer.generate_square_subsequent_mask).
    causal = jnp.where(jnp.arange(S)[None, :] <= jnp.arange(S)[:, None],
                       0.0, -jnp.inf).astype(jnp.float32)

    # Exercise: no mask, causal mask, and causal mask with block-skip (is_causal=True).
    for mask, is_causal in ((None, False), (causal, False), (causal, True)):
        out = jax.block_until_ready(
            transformer_encoder(src, mask, layer_params, final_norm_params, H,
                                is_causal=is_causal))
        ref_mask = mask if mask is not None else (causal if is_causal else None)
        ref = ref_encoder(src, ref_mask, layer_params, final_norm_params, H)
        assert out.shape == (B, S, E)
        assert out.dtype == src.dtype
        assert jnp.allclose(out, ref, rtol=3e-2, atol=3e-2), "mismatch vs reference"
    print("KERNEL_OK")
</pallas_src>

<mosaic_0001>
module attributes {stable_mosaic.version = 11 : i64} {
  func.func @kernel(%arg0: i32, %arg1: i32, %arg2: memref<1x8x32xf32, #tpu.memory_space<vmem>>, %arg3: memref<32x64xbf16, #tpu.memory_space<vmem>>, %arg4: memref<1x64xf32, #tpu.memory_space<vmem>>, %arg5: memref<1x2x4x8x8xbf16, #tpu.memory_space<vmem>>) attributes {dimension_semantics = [#tpu.dimension_semantics<parallel>, #tpu.dimension_semantics<parallel>], iteration_bounds = array<i64: 2, 1>, scalar_prefetch = 0 : i64, scratch_operands = 0 : i64, tpu.core_type = #tpu.core_type<tc>, window_params = [{transform_indices = @transform_0, window_bounds = array<i64: 1, 8, 32>}, {pipeline_mode = #tpu.pipeline_mode<synchronous>, transform_indices = @transform_1, window_bounds = array<i64: 32, 64>}, {pipeline_mode = #tpu.pipeline_mode<synchronous>, transform_indices = @transform_2, window_bounds = array<i64: 1, 64>}, {transform_indices = @transform_3, window_bounds = array<i64: 1, 2, 4, 8, 8>}]} {
    %c0 = arith.constant 0 : index
    %c0_0 = arith.constant 0 : index
    %c0_1 = arith.constant 0 : index
    %0 = vector.load %arg2[%c0, %c0_0, %c0_1] : memref<1x8x32xf32, #tpu.memory_space<vmem>>, vector<1x8x32xf32>
    %1 = vector.shape_cast %0 : vector<1x8x32xf32> to vector<8x32xf32>
    %2 = arith.truncf %1 : vector<8x32xf32> to vector<8x32xbf16>
    %c0_2 = arith.constant 0 : index
    %c0_3 = arith.constant 0 : index
    %3 = vector.load %arg3[%c0_2, %c0_3] : memref<32x64xbf16, #tpu.memory_space<vmem>>, vector<32x64xbf16>
    %cst = arith.constant dense<0.000000e+00> : vector<8x64xf32>
    %4 = tpu.matmul %2, %3, %cst {dimension_numbers = #tpu.dot_dimension_numbers<[1], [0], [0], [1], [0, 0, 1, 1], [], []>} : vector<8x32xbf16>, vector<32x64xbf16>, vector<8x64xf32> -> vector<8x64xf32>
    %c0_4 = arith.constant 0 : index
    %c0_5 = arith.constant 0 : index
    %5 = vector.load %arg4[%c0_4, %c0_5] : memref<1x64xf32, #tpu.memory_space<vmem>>, vector<1x64xf32>
    %6 = vector.broadcast %5 : vector<1x64xf32> to vector<8x64xf32>
    %7 = arith.addf %4, %6 : vector<8x64xf32>
    %8 = vector.extract_strided_slice %7 {offsets = [0, 0], sizes = [8, 8], strides = [1, 1]} : vector<8x64xf32> to vector<8x8xf32>
    %9 = arith.truncf %8 : vector<8x8xf32> to vector<8x8xbf16>
    %c0_6 = arith.constant 0 : index
    %c0_7 = arith.constant 0 : index
    %c0_8 = arith.constant 0 : index
    %c0_9 = arith.constant 0 : index
    %c0_10 = arith.constant 0 : index
    %10 = vector.load %arg5[%c0_6, %c0_7, %c0_8, %c0_9, %c0_10] : memref<1x2x4x8x8xbf16, #tpu.memory_space<vmem>>, vector<1x1x1x8x8xbf16>
    %11 = vector.shape_cast %10 : vector<1x1x1x8x8xbf16> to vector<8x8xbf16>
    %12 = vector.shape_cast %9 : vector<8x8xbf16> to vector<1x1x1x8x8xbf16>
    tpu.vector_store %arg5[%c0_6, %c0_7, %c0_8, %c0_9, %c0_10], %12 {strides = array<i32>} : memref<1x2x4x8x8xbf16, #tpu.memory_space<vmem>>, vector<1x1x1x8x8xbf16>,
    %13 = vector.extract_strided_slice %7 {offsets = [0, 32], sizes = [8, 8], strides = [1, 1]} : vector<8x64xf32> to vector<8x8xf32>
    %14 = arith.truncf %13 : vector<8x8xf32> to vector<8x8xbf16>
    %c0_11 = arith.constant 0 : index
    %c1 = arith.constant 1 : index
    %c0_12 = arith.constant 0 : index
    %c0_13 = arith.constant 0 : index
    %c0_14 = arith.constant 0 : index
    %15 = vector.load %arg5[%c0_11, %c1, %c0_12, %c0_13, %c0_14] : memref<1x2x4x8x8xbf16, #tpu.memory_space<vmem>>, vector<1x1x1x8x8xbf16>
    %16 = vector.shape_cast %15 : vector<1x1x1x8x8xbf16> to vector<8x8xbf16>
    %17 = vector.shape_cast %14 : vector<8x8xbf16> to vector<1x1x1x8x8xbf16>
    tpu.vector_store %arg5[%c0_11, %c1, %c0_12, %c0_13, %c0_14], %17 {strides = array<i32>} : memref<1x2x4x8x8xbf16, #tpu.memory_space<vmem>>, vector<1x1x1x8x8xbf16>,
    %18 = vector.extract_strided_slice %7 {offsets = [0, 8], sizes = [8, 8], strides = [1, 1]} : vector<8x64xf32> to vector<8x8xf32>
    %19 = arith.truncf %18 : vector<8x8xf32> to vector<8x8xbf16>
    %c0_15 = arith.constant 0 : index
    %c0_16 = arith.constant 0 : index
    %c1_17 = arith.constant 1 : index
    %c0_18 = arith.constant 0 : index
    %c0_19 = arith.constant 0 : index
    %20 = vector.load %arg5[%c0_15, %c0_16, %c1_17, %c0_18, %c0_19] : memref<1x2x4x8x8xbf16, #tpu.memory_space<vmem>>, vector<1x1x1x8x8xbf16>
    %21 = vector.shape_cast %20 : vector<1x1x1x8x8xbf16> to vector<8x8xbf16>
    %22 = vector.shape_cast %19 : vector<8x8xbf16> to vector<1x1x1x8x8xbf16>
    tpu.vector_store %arg5[%c0_15, %c0_16, %c1_17, %c0_18, %c0_19], %22 {strides = array<i32>} : memref<1x2x4x8x8xbf16, #tpu.memory_space<vmem>>, vector<1x1x1x8x8xbf16>,
    %23 = vector.extract_strided_slice %7 {offsets = [0, 40], sizes = [8, 8], strides = [1, 1]} : vector<8x64xf32> to vector<8x8xf32>
    %24 = arith.truncf %23 : vector<8x8xf32> to vector<8x8xbf16>
    %c0_20 = arith.constant 0 : index
    %c1_21 = arith.constant 1 : index
    %c1_22 = arith.constant 1 : index
    %c0_23 = arith.constant 0 : index
    %c0_24 = arith.constant 0 : index
    %25 = vector.load %arg5[%c0_20, %c1_21, %c1_22, %c0_23, %c0_24] : memref<1x2x4x8x8xbf16, #tpu.memory_space<vmem>>, vector<1x1x1x8x8xbf16>
    %26 = vector.shape_cast %25 : vector<1x1x1x8x8xbf16> to vector<8x8xbf16>
    %27 = vector.shape_cast %24 : vector<8x8xbf16> to vector<1x1x1x8x8xbf16>
    tpu.vector_store %arg5[%c0_20, %c1_21, %c1_22, %c0_23, %c0_24], %27 {strides = array<i32>} : memref<1x2x4x8x8xbf16, #tpu.memory_space<vmem>>, vector<1x1x1x8x8xbf16>,
    %28 = vector.extract_strided_slice %7 {offsets = [0, 16], sizes = [8, 8], strides = [1, 1]} : vector<8x64xf32> to vector<8x8xf32>
    %29 = arith.truncf %28 : vector<8x8xf32> to vector<8x8xbf16>
    %c0_25 = arith.constant 0 : index
    %c0_26 = arith.constant 0 : index
    %c2 = arith.constant 2 : index
    %c0_27 = arith.constant 0 : index
    %c0_28 = arith.constant 0 : index
    %30 = vector.load %arg5[%c0_25, %c0_26, %c2, %c0_27, %c0_28] : memref<1x2x4x8x8xbf16, #tpu.memory_space<vmem>>, vector<1x1x1x8x8xbf16>
    %31 = vector.shape_cast %30 : vector<1x1x1x8x8xbf16> to vector<8x8xbf16>
    %32 = vector.shape_cast %29 : vector<8x8xbf16> to vector<1x1x1x8x8xbf16>
    tpu.vector_store %arg5[%c0_25, %c0_26, %c2, %c0_27, %c0_28], %32 {strides = array<i32>} : memref<1x2x4x8x8xbf16, #tpu.memory_space<vmem>>, vector<1x1x1x8x8xbf16>,
    %33 = vector.extract_strided_slice %7 {offsets = [0, 48], sizes = [8, 8], strides = [1, 1]} : vector<8x64xf32> to vector<8x8xf32>
    %34 = arith.truncf %33 : vector<8x8xf32> to vector<8x8xbf16>
    %c0_29 = arith.constant 0 : index
    %c1_30 = arith.constant 1 : index
    %c2_31 = arith.constant 2 : index
    %c0_32 = arith.constant 0 : index
    %c0_33 = arith.constant 0 : index
    %35 = vector.load %arg5[%c0_29, %c1_30, %c2_31, %c0_32, %c0_33] : memref<1x2x4x8x8xbf16, #tpu.memory_space<vmem>>, vector<1x1x1x8x8xbf16>
    %36 = vector.shape_cast %35 : vector<1x1x1x8x8xbf16> to vector<8x8xbf16>
    %37 = vector.shape_cast %34 : vector<8x8xbf16> to vector<1x1x1x8x8xbf16>
    tpu.vector_store %arg5[%c0_29, %c1_30, %c2_31, %c0_32, %c0_33], %37 {strides = array<i32>} : memref<1x2x4x8x8xbf16, #tpu.memory_space<vmem>>, vector<1x1x1x8x8xbf16>,
    %38 = vector.extract_strided_slice %7 {offsets = [0, 24], sizes = [8, 8], strides = [1, 1]} : vector<8x64xf32> to vector<8x8xf32>
    %39 = arith.truncf %38 : vector<8x8xf32> to vector<8x8xbf16>
    %c0_34 = arith.constant 0 : index
    %c0_35 = arith.constant 0 : index
    %c3 = arith.constant 3 : index
    %c0_36 = arith.constant 0 : index
    %c0_37 = arith.constant 0 : index
    %40 = vector.load %arg5[%c0_34, %c0_35, %c3, %c0_36, %c0_37] : memref<1x2x4x8x8xbf16, #tpu.memory_space<vmem>>, vector<1x1x1x8x8xbf16>
    %41 = vector.shape_cast %40 : vector<1x1x1x8x8xbf16> to vector<8x8xbf16>
    %42 = vector.shape_cast %39 : vector<8x8xbf16> to vector<1x1x1x8x8xbf16>
    tpu.vector_store %arg5[%c0_34, %c0_35, %c3, %c0_36, %c0_37], %42 {strides = array<i32>} : memref<1x2x4x8x8xbf16, #tpu.memory_space<vmem>>, vector<1x1x1x8x8xbf16>,
    %43 = vector.extract_strided_slice %7 {offsets = [0, 56], sizes = [8, 8], strides = [1, 1]} : vector<8x64xf32> to vector<8x8xf32>
    %44 = arith.truncf %43 : vector<8x8xf32> to vector<8x8xbf16>
    %c0_38 = arith.constant 0 : index
    %c1_39 = arith.constant 1 : index
    %c3_40 = arith.constant 3 : index
    %c0_41 = arith.constant 0 : index
    %c0_42 = arith.constant 0 : index
    %45 = vector.load %arg5[%c0_38, %c1_39, %c3_40, %c0_41, %c0_42] : memref<1x2x4x8x8xbf16, #tpu.memory_space<vmem>>, vector<1x1x1x8x8xbf16>
    %46 = vector.shape_cast %45 : vector<1x1x1x8x8xbf16> to vector<8x8xbf16>
    %47 = vector.shape_cast %44 : vector<8x8xbf16> to vector<1x1x1x8x8xbf16>
    tpu.vector_store %arg5[%c0_38, %c1_39, %c3_40, %c0_41, %c0_42], %47 {strides = array<i32>} : memref<1x2x4x8x8xbf16, #tpu.memory_space<vmem>>, vector<1x1x1x8x8xbf16>,
    return
  }
  func.func @transform_0(%arg0: i32, %arg1: i32) -> (i32, i32, i32) {
    %c0_i32 = arith.constant 0 : i32
    %c0_i32_0 = arith.constant 0 : i32
    return %arg0, %arg1, %c0_i32 : i32, i32, i32
  }
  func.func @transform_1(%arg0: i32, %arg1: i32) -> (i32, i32) {
    %c0_i32 = arith.constant 0 : i32
    %c0_i32_0 = arith.constant 0 : i32
    %c0_i32_1 = arith.constant 0 : i32
    return %c0_i32, %c0_i32_0 : i32, i32
  }
  func.func @transform_2(%arg0: i32, %arg1: i32) -> (i32, i32) {
    %c0_i32 = arith.constant 0 : i32
    %c0_i32_0 = arith.constant 0 : i32
    %c0_i32_1 = arith.constant 0 : i32
    return %c0_i32, %c0_i32_0 : i32, i32
  }
  func.func @transform_3(%arg0: i32, %arg1: i32) -> (i32, i32, i32, i32, i32) {
    %c0_i32 = arith.constant 0 : i32
    %c0_i32_0 = arith.constant 0 : i32
    %c0_i32_1 = arith.constant 0 : i32
    %c0_i32_2 = arith.constant 0 : i32
    return %arg0, %c0_i32, %c0_i32_0, %arg1, %c0_i32_1 : i32, i32, i32, i32, i32
  }
}

</mosaic_0001>

<bundles_post_ra>
// kernel: tpu_custom_call.1
= control target key start
LH: loop header
LB: loop body
LE: loop exit
PB: predicated region body
PF: predicated region fallthrough
CT: control target
= control target key end

     0   :  { %8 = vsyncpa [#allocation3], 0  ;;  %s878_s0 = inlined_call_operand.hbm [shape: f32[2,8,32], index: 0, kind: input, shape index: {}]   ;;  %s879_s1 = inlined_call_operand.hbm [shape: bf16[32,64], index: 1, kind: input, shape index: {}]   ;;  %s880_s2 = inlined_call_operand.vmem [shape: f32[1,64], index: 2, kind: input, shape index: {}]   ;;  %s881_s3 = inlined_call_operand.hbm [shape: bf16[2,2,4,8,8], index: 3, kind: output, shape index: {}]  }
   0x1   :  { %10 = vsyncpa [#allocation3 + $0x1], 0 }
   0x2   :  { %11 = vsyncpa [#allocation6], 0 }
   0x3   :  { %12 = vsyncpa [#allocation4], 0 }
   0x4   :  { %14 = vsyncpa [#allocation4 + $0x1], 0  ;;  %s712_s12 = smov 0   ;;  %s714_s13 = smov 0  }
   0x5   :  { %s716_s14 = smov 0   ;;  %s718_s15 = smov 0  }
   0x6   :  { %s720_s16 = smov 0   ;;  %s722_s17 = smov 0  }
   0x7 LB: > { %s412_s18 = sadd.s32 4294967295, %s678_s17   ;;  %p414_p0 = scmp.ge.s32.totalorder %s678_s17, 1  ;;  %s678_s17 = sphi %s722_s17, %s20_s17   ;;  %s674_s16 = sphi %s720_s16, %s892_s16   ;;  %s670_s15 = sphi %s718_s15, %s891_s15   ;;  %s666_s14 = sphi %s716_s14, %s890_s14   ;;  %s662_s13 = sphi %s714_s13, %s889_s13   ;;  %s658_s12 = sphi %s712_s12, %s888_s12  }
   0x8   : > { %p744_p1 = scmp.eq.s32.totalorder %s412_s18, 0  ;;  %p135_p2 = scmp.lt.s32.totalorder %s678_s17, 3 }
   0x9   : > { %s146_s22 = sshll.u32 %s879_s1, 4  ;;  %s680_s24 = smov [#allocation5]   ;;  %s147_s22 = int_to_ptr.hbm [resolvable:$true] %s146_s22 }
   0xa   : > { %p752_p3 = pnand %p414_p0, %p135_p2  ;;  %s148_s25 = sshll.u32 %s680_s24, 4  ;;  %s149_s25 = int_to_ptr.vmem [resolvable:$true] %s148_s25 }
   0xb   : > { %p416_p6 = scmp.ge.s32.totalorder %s678_s17, 2  ;;  %s681_s26 = smov 64  }
   0xc   : > { %p455_p4 = pneg %p752_p3  ;;  %s682_s27 = smov 4  }
   0xd   : > { %s413_s28 = sadd.s32 4294967294, %s678_s17   ;;  %s32_s29 = sadd.s32 1, %s674_s16 }
   0xe   : > { %p456_p5 = pnand %p455_p4, %p744_p1  ;;  %s41_s30 = sadd.s32 1, %s666_s14 }
   0xf   : > { %p34_p7 = scmp.ge.s32.totalorder %s32_s29, 2  ;;  %p48_p8 = scmp.ne.s32.totalorder %s666_s14, %s662_s13 }
  0x10   : > { %458 = dma.hbm_to_vmem [thread:$0]  (!%p456_p5), %s147_s22, 256, %s149_s25, [#allocation6], %s681_s26, %s681_s26, %s682_s27  }
  0x11   : > { %p49_p9 = scmp.eq.s32.totalorder %s678_s17, 0  ;;  %p54_p10 = scmp.ne.s32.totalorder %s662_s13, %s658_s12 }
  0x12   : > { %s894_s29 = smov (%p34_p7, %s32_s29), 0  ;;  %p122_p13 = scmp.eq.s32.totalorder %s412_s18, 1 }
  0x13   : > { %p771_p11 = por %p49_p9, %p48_p8  ;;  %p777_p12 = por %p744_p1, %p54_p10 }
  0x14   : > { %s36_s6 = ssub.s32 %s674_s16, %s894_s29  ;;  %p128_p2 = scmp.eq.s32.totalorder %s413_s28, 1 }
  0x15   : > { %p39_p0 = scmp.eq.s32.totalorder %s36_s6, 0  ;;  %p783_p4 = por %p122_p13, %p48_p8 }
  0x16   : > { %p468_p5 = scmp.lt.s32.totalorder %s678_s17, 2  ;;  %p791_p7 = por %p128_p2, %p54_p10 }
  0x17   : > { %s789_s8 = scalar_select %p39_p0, %s666_s14, %s41_s30  }
  0x18   : > { %s165_s10 = sand.u32 1, %s666_s14   ;;  %s418_s20 = sshll.u32 %s674_s16, 3 }
  0x19   : > { %s417_s11 = sshll.u32 %s165_s10, 3  ;;  %s174_s18 = scalar_lea.hbm %s878_s0, %s418_s20 }
  0x1a   : > { %s169_s24 = scalar_lea.vmem [#allocation2], %s417_s11  ;;  %s176_s26 = sshll.u32 %s174_s18, 4  ;;  %s177_s26 = int_to_ptr.hbm [resolvable:$true] %s176_s26 }
  0x1b   : > { %s178_s25 = sshll.u32 %s169_s24, 4  ;;  %p460_p8 = pnand %p468_p5, %p771_p11  ;;  %s179_s25 = int_to_ptr.vmem [resolvable:$true] %s178_s25 }
  0x1c   : > { %s166_s27 = scalar_lea.sflag [#allocation3], %s165_s10  ;;  %187 = sbr.rel (%p752_p3) target bundleno = 310 (0x136), region = 32 }
  0x1d   : > { %462 = dma.hbm_to_vmem [thread:$0]  (!%p460_p8), %s177_s26, 128, %s179_s25, %s166_s27  }
  0x1e   : > { %s805_s28 = sand.u32 (!%p752_p3), 1, %s662_s13  }
  0x1f   : > { %s420_s30 = sshll.u32 (!%p752_p3), %s805_s28, 3  ;;  %s190_s6 = scalar_lea.sflag (!%p752_p3), [#allocation3], %s805_s28 }
  0x20   : > { %s193_s11 = scalar_lea.vmem (!%p752_p3), [#allocation2], %s420_s30 }
  0x21   : > { %645 = dma.done.wait (%p777_p12), %s190_s6, 128  }
  0x22   : > { %647 = vsyncadd (%p777_p12), %s190_s6, 4294967168 }
  0x23   : > { %649 = dma.done.wait (%p744_p1), [#allocation6], 256  }
  0x24   : > { %651 = vsyncadd (%p744_p1), [#allocation6], 4294967040  ;;  %v445_v0 = vld [vmem:[#allocation5 + $0x8] sm:$0xff]  ;;  %v444_v1 = vld [vmem:[#allocation5] sm:$0xff]  ;;  %vm245_vm0 = vcmask 261120   ;;  %s422_s5 = sshll.u32 %s805_s28, 5 }
  0x25   : > { %255 = vmatpush.bf16.msra.mxu0 %v445_v0  ;;  %v223_v2 = vld [vmem:[%s193_s11] sm:$0xff]  ;;  %vm263_vm1 = vcmask 60416   ;;  %s683_s19 = smov 80   ;;  %s684_s10 = smov 88  }
  0x26   : > { %v224_v3 = vpack.c.bf16 %v223_v2, %v223_v2  ;;  %v531_v4 = vld [vmem:[%s880_s2] ss:$0 sm:$0xff]  ;;  %s821_s20 = scalar_lea.vmem [#allocation7], %s422_s5  ;;  %s685_s21 = smov 96  }
  0x27   : > { %s686_s22 = smov 104   ;;  %s687_s18 = smov 112  }
  0x28   : > { %s688_s24 = smov 120   ;;  %s689_s25 = smov 72  }
  0x29   : > { %256 = vmatpush.bf16.msra.mxu0 %v444_v1  ;;  %s446_s26 = sshll.u32 %s670_s15, 5  ;;  %s315_s11 = sshll.u32 %s821_s20, 4  ;;  %s316_s11 = int_to_ptr.vmem [resolvable:$true] %s315_s11 }
  0x2a   : > { %s314_s6 = scalar_lea.hbm %s881_s3, %s446_s26  ;;  %s302_s4 = scalar_lea.sflag [#allocation4], %s805_s28 }
  0x2b   : > { %s317_s23 = sshll.u32 %s314_s6, 4  ;;  %s318_s23 = int_to_ptr.hbm [resolvable:$true] %s317_s23 }
  0x2c   : > { %431 = vmatmul.msk.bf16.vlgmr.msra.gmra.mxu0 %vm245_vm0, %v224_v3  ;;  %s606_s15 = sshra.s32 %s318_s23, 4  ;;  %s607_s15 = int_to_ptr.hbm [resolvable:$true] %s606_s15 }
  0x2d   : > { %s608_s5 = scalar_lea.hbm %s607_s15, 32  ;;  %p613_p10 = scmp.lt.s32.totalorder %s607_s15, %s881_s3 }
  0x2e   : > { %p609_p1 = scmp.ne.s32.totalorder %s607_s15, %s608_s5 }
  0x30   : > { %p610_p3 = pnand %p609_p1, %p783_p4 }
  0x32   : > { %p611_p9 = pneg %p610_p3 }
  0xa9   : > { %v258_v5 = vpop.f32.mrf.mxu0 }
  0xaa   : > { %v259_v6 = vadd.f32 %v531_v4, %v258_v5 }
  0xac   : > { %v262_v7 = vpack.c.bf16 %v259_v6, %v259_v6 }
  0xae   : > { %286 = vrot.lane.b32.xlu2 %v262_v7, %s683_s19  ;;  %276 = vrot.lane.b32.xlu1 %v262_v7, %s684_s10  ;;  %264 = vst.msk [vmem:[%s821_s20] sm:$0xf] %vm263_vm1, %v262_v7 }
  0xaf   : > { %266 = vrot.lane.b32.xlu0 %v262_v7, %s685_s21  ;;  %s612_s21 = scalar_lea.hbm %s881_s3, 64 }
  0xb0   : > { %p614_p11 = scmp.lt.s32.totalorder %s612_s21, %s608_s5 }
  0xb1   : > { %v260_v8 = vpop.f32.mrf.mxu0 }
  0xb2   : > { %p615_p12 = por %p614_p11, %p613_p10 }
  0xb4   : > { %p616_p13 = pnand %p615_p12, %p611_p9 }
  0xb6   : > { %291 = vrot.lane.b32.xlu2 %v262_v7, %s686_s22  ;;  %281 = vrot.lane.b32.xlu1 %v262_v7, %s687_s18 }
  0xb7   : > { %271 = vrot.lane.b32.xlu0 %v262_v7, %s688_s24 }
  0xbf   : > { %296 = vrot.lane.b32.xlu0 %v262_v7, %s689_s25 }
 0x108   : > { %v287_v9 = vpop.permute.xlu2 %286 }
 0x109   : > { %436 = vst.msk [vmem:[%s821_s20 + $0x18] sm:$0xf] %vm263_vm1, %v287_v9 }
 0x110   : > { %v292_v10 = vpop.permute.xlu2 %291 }
 0x111   : > { %437 = vst.msk [vmem:[%s821_s20 + $0xc] sm:$0xf] %vm263_vm1, %v292_v10 }
 0x120   : > { %v277_v11 = vpop.permute.xlu1 %276 }
 0x121   : > { %434 = vst.msk [vmem:[%s821_s20 + $0x14] sm:$0xf] %vm263_vm1, %v277_v11  ;;  %v267_v12 = vpop.permute.xlu0 %266 }
 0x122   : > { %432 = vst.msk [vmem:[%s821_s20 + $0x10] sm:$0xf] %vm263_vm1, %v267_v12 }
 0x128   : > { %v282_v13 = vpop.permute.xlu1 %281 }
 0x129   : > { %435 = vst.msk [vmem:[%s821_s20 + $0x8] sm:$0xf] %vm263_vm1, %v282_v13  ;;  %v272_v14 = vpop.permute.xlu0 %271 }
 0x12a   : > { %433 = vst.msk [vmem:[%s821_s20 + $0x4] sm:$0xf] %vm263_vm1, %v272_v14 }
 0x131   : > { %v297_v15 = vpop.permute.xlu0 %296 }
 0x132   : > { %438 = vst.msk [vmem:[%s821_s20 + $0x1c] sm:$0xf] %vm263_vm1, %v297_v15 }
 0x133   : > { %619 = shalt.err (!%p616_p13)
}
 0x134   : > { %s690_s28 = smov 64   ;;  %s691_s20 = smov 4  }
 0x135   : > { %453 = dma.vmem_to_hbm [thread:$0]  (%p783_p4), %s316_s11, 512, %s318_s23, %s302_s4, %s690_s28, %s690_s28, %s691_s20  }
 0x136 PF: > { %s332_s24 = sand.u32 1, %s658_s12   ;;  %p464_p0 = pnand %p416_p6, %p791_p7 }
 0x137   : > { %s333_s25 = scalar_lea.sflag [#allocation4], %s332_s24 }
 0x138   : > { %p465_p2 = pneg %p464_p0 }
 0x13a   : > { %653 = dma.done.wait (%p465_p2), %s333_s25, 512  }
 0x13b   : > { %655 = vsyncadd (%p465_p2), %s333_s25, 4294966784  ;;  %s20_s17 = sadd.s32 1, %s678_s17   ;;  %s888_s12 = smov %s662_s13 }
 0x13c   : > { %p17_p5 = scmp.ge.s32.totalorder %s20_s17, 4   ;;  %s889_s13 = smov %s666_s14 }
 0x13d   : > { %s890_s14 = smov %s789_s8  ;;  %s891_s15 = smov %s674_s16 }
 0x13e   : > { %s892_s16 = smov %s894_s29  ;;  %19 = sbr.rel (!%p17_p5) target bundleno = 7 (0x7), region = 88 }
 0x143   :  { %339 = vsyncpa [#allocation3], 1 }
 0x144   :  { %341 = vsyncpa [#allocation3 + $0x1], 1 }
 0x145   :  { %342 = vsyncpa [#allocation6], 1 }
 0x146   :  { %343 = vsyncpa [#allocation4], 1 }
 0x147   :  { %345 = vsyncpa [#allocation4 + $0x1], 1 }

</bundles_post_ra>
